<compile_context>
chip_gen: v5e
topology: v5e:2x2
jax: 0.10.0
libtpu: 0.0.40
codegen_flags: <defaults>
</compile_context>

<pallas_src>
import jax
import jax.numpy as jnp
from jax.experimental import pallas as pl
from jax.experimental.pallas import tpu as pltpu

EPS = 1e-5      # nn.BatchNorm2d default eps
LANE = 128


# ------------------------------ Pallas kernels -------------------------------
def _tile_stats(acc):
    """Per-tile BN partials: rows [sum, sum_sq, 0...] of shape (8, Coutp)."""
    s = jnp.sum(acc, axis=0, keepdims=True)
    ss = jnp.sum(acc * acc, axis=0, keepdims=True)
    pad = jnp.zeros((6, acc.shape[1]), jnp.float32)
    return jnp.concatenate([s, ss, pad], axis=0)


def _matmul_stats_kernel(p_ref, w_ref, y_ref, st_ref):
    """y = patches @ W (bf16 in, f32 acc) + per-tile sum / sum-of-squares."""
    acc = jnp.dot(p_ref[...], w_ref[...], preferred_element_type=jnp.float32)
    y_ref[...] = acc
    st_ref[0] = _tile_stats(acc)


def _dual_matmul_stats_kernel(p2_ref, w2_ref, psc_ref, wsc_ref,
                              y2_ref, ysc_ref, st2_ref, stsc_ref):
    """conv2 matmul + fused 1x1 projection-shortcut matmul, each with stats."""
    acc2 = jnp.dot(p2_ref[...], w2_ref[...], preferred_element_type=jnp.float32)
    accsc = jnp.dot(psc_ref[...], wsc_ref[...], preferred_element_type=jnp.float32)
    y2_ref[...] = acc2
    ysc_ref[...] = accsc
    st2_ref[0] = _tile_stats(acc2)
    stsc_ref[0] = _tile_stats(accsc)


def _bn_relu_kernel(y_ref, scale_ref, shift_ref, o_ref):
    """o = relu(y * scale + shift)   (all BN math in f32)."""
    y = y_ref[...] * scale_ref[...] + shift_ref[...]
    o_ref[...] = jnp.maximum(y, 0.0).astype(o_ref.dtype)


def _bn_add_relu_kernel(y_ref, ysc_ref, s2_ref, b2_ref, ssc_ref, bsc_ref, o_ref):
    """o = relu(BN2(y2) + BN_sc(y_sc)); identity shortcut uses scale=1, shift=0."""
    y = y_ref[...] * s2_ref[...] + b2_ref[...]
    sc = ysc_ref[...].astype(jnp.float32) * ssc_ref[...] + bsc_ref[...]
    o_ref[...] = jnp.maximum(y + sc, 0.0).astype(o_ref.dtype)


# ------------------------------ small utilities ------------------------------
def _round_up(x, m):
    return (x + m - 1) // m * m


def _vmem_capacity_bytes():
    try:
        cap = getattr(pltpu.get_tpu_info(), "vmem_capacity_bytes", None)
        if cap:
            return int(cap)
    except Exception:
        pass
    return 64 * 2**20          # conservative (v7x-sized) fallback


def _choose_tile_m(m, per_row_bytes, resident_bytes, budget_bytes):
    """Largest M tile (double-buffered) that fits the VMEM budget."""
    max_useful = _round_up(max(m, 1), 128)
    for cand in (4096, 2048, 1024, 512, 256, 128):
        if cand > max_useful:
            continue
        if 2 * cand * per_row_bytes + resident_bytes <= budget_bytes:
            return cand
    return 128


def _prep_patches(p, m_pad, kp):
    m, k = p.shape
    p = jnp.pad(p, ((0, m_pad - m), (0, kp - k)))
    return p.astype(jnp.bfloat16)


def weight_to_mat(w_oihw):
    """PyTorch (Cout, Cin, kh, kw) -> (kh*kw*Cin, Cout), matching im2col order."""
    cout = w_oihw.shape[0]
    return jnp.transpose(w_oihw, (2, 3, 1, 0)).reshape(-1, cout)


def _prep_weight(w_oihw, kp, coutp):
    wm = weight_to_mat(w_oihw)
    k, cout = wm.shape
    wm = jnp.pad(wm, ((0, kp - k), (0, coutp - cout)))
    return wm.astype(jnp.bfloat16)


def _pad_vec(v, coutp):
    return jnp.pad(v.astype(jnp.float32), (0, coutp - v.shape[0]))


def im2col(x_nhwc, ksize, stride, padding):
    """Extract conv patches. Returns (N*Ho*Wo, k*k*C) and output spatial dims."""
    n, h, w, c = x_nhwc.shape
    ho = (h + 2 * padding - ksize) // stride + 1
    wo = (w + 2 * padding - ksize) // stride + 1
    xp = jnp.pad(x_nhwc, ((0, 0), (padding, padding), (padding, padding), (0, 0)))
    cols = []
    for kh in range(ksize):
        for kw in range(ksize):
            cols.append(
                xp[:, kh:kh + (ho - 1) * stride + 1:stride,
                      kw:kw + (wo - 1) * stride + 1:stride, :])
    patches = jnp.stack(cols, axis=3)           # (N, Ho, Wo, k*k, C)
    return patches.reshape(n * ho * wo, ksize * ksize * c), (n, ho, wo)


def bn_affine(stats, m_true, gamma_p, beta_p):
    """Finalize BN batch stats from per-tile partials -> per-channel scale/shift.

    One-pass sum/sumsq form kept in f32; fine at these sizes (see review note).
    """
    s = jnp.sum(stats[:, 0, :], axis=0)
    ss = jnp.sum(stats[:, 1, :], axis=0)
    mean = s / m_true
    var = jnp.maximum(ss / m_true - mean * mean, 0.0)
    inv = jax.lax.rsqrt(var + EPS)
    scale = gamma_p * inv
    shift = beta_p - mean * scale
    return scale, shift


# ---------------------------- pallas_call wrappers ----------------------------
def matmul_stats(patches, w2d, *, tile_m, cparams):
    m_pad, kp = patches.shape
    coutp = w2d.shape[1]
    nt = m_pad // tile_m
    grid_spec = pltpu.PrefetchScalarGridSpec(
        num_scalar_prefetch=0, grid=(nt,),
        in_specs=[pl.BlockSpec((tile_m, kp), lambda i: (i, 0)),
                  pl.BlockSpec((kp, coutp), lambda i: (0, 0))],
        out_specs=[pl.BlockSpec((tile_m, coutp), lambda i: (i, 0)),
                   pl.BlockSpec((1, 8, coutp), lambda i: (i, 0, 0))])
    return pl.pallas_call(
        _matmul_stats_kernel,
        out_shape=(jax.ShapeDtypeStruct((m_pad, coutp), jnp.float32),
                   jax.ShapeDtypeStruct((nt, 8, coutp), jnp.float32)),
        grid_spec=grid_spec, compiler_params=cparams,
    )(patches, w2d)


def dual_matmul_stats(p2, w2, psc, wsc, *, tile_m, cparams):
    m_pad, kp2 = p2.shape
    kscp = psc.shape[1]
    coutp = w2.shape[1]
    nt = m_pad // tile_m
    grid_spec = pltpu.PrefetchScalarGridSpec(
        num_scalar_prefetch=0, grid=(nt,),
        in_specs=[pl.BlockSpec((tile_m, kp2), lambda i: (i, 0)),
                  pl.BlockSpec((kp2, coutp), lambda i: (0, 0)),
                  pl.BlockSpec((tile_m, kscp), lambda i: (i, 0)),
                  pl.BlockSpec((kscp, coutp), lambda i: (0, 0))],
        out_specs=[pl.BlockSpec((tile_m, coutp), lambda i: (i, 0)),
                   pl.BlockSpec((tile_m, coutp), lambda i: (i, 0)),
                   pl.BlockSpec((1, 8, coutp), lambda i: (i, 0, 0)),
                   pl.BlockSpec((1, 8, coutp), lambda i: (i, 0, 0))])
    return pl.pallas_call(
        _dual_matmul_stats_kernel,
        out_shape=(jax.ShapeDtypeStruct((m_pad, coutp), jnp.float32),
                   jax.ShapeDtypeStruct((m_pad, coutp), jnp.float32),
                   jax.ShapeDtypeStruct((nt, 8, coutp), jnp.float32),
                   jax.ShapeDtypeStruct((nt, 8, coutp), jnp.float32)),
        grid_spec=grid_spec, compiler_params=cparams,
    )(p2, w2, psc, wsc)


def bn_relu(y, scale, shift, *, tile_m, cparams, out_dtype):
    m_pad, coutp = y.shape
    nt = m_pad // tile_m
    grid_spec = pltpu.PrefetchScalarGridSpec(
        num_scalar_prefetch=0, grid=(nt,),
        in_specs=[pl.BlockSpec((tile_m, coutp), lambda i: (i, 0)),
                  pl.BlockSpec((1, coutp), lambda i: (0, 0)),
                  pl.BlockSpec((1, coutp), lambda i: (0, 0))],
        out_specs=pl.BlockSpec((tile_m, coutp), lambda i: (i, 0)))
    return pl.pallas_call(
        _bn_relu_kernel,
        out_shape=jax.ShapeDtypeStruct((m_pad, coutp), out_dtype),
        grid_spec=grid_spec, compiler_params=cparams,
    )(y, scale.reshape(1, coutp), shift.reshape(1, coutp))


def bn_add_relu(y2, ysc, s2, b2, ssc, bsc, *, tile_m, cparams):
    m_pad, coutp = y2.shape
    nt = m_pad // tile_m
    grid_spec = pltpu.PrefetchScalarGridSpec(
        num_scalar_prefetch=0, grid=(nt,),
        in_specs=[pl.BlockSpec((tile_m, coutp), lambda i: (i, 0)),
                  pl.BlockSpec((tile_m, coutp), lambda i: (i, 0)),
                  pl.BlockSpec((1, coutp), lambda i: (0, 0)),
                  pl.BlockSpec((1, coutp), lambda i: (0, 0)),
                  pl.BlockSpec((1, coutp), lambda i: (0, 0)),
                  pl.BlockSpec((1, coutp), lambda i: (0, 0))],
        out_specs=pl.BlockSpec((tile_m, coutp), lambda i: (i, 0)))
    return pl.pallas_call(
        _bn_add_relu_kernel,
        out_shape=jax.ShapeDtypeStruct((m_pad, coutp), jnp.float32),
        grid_spec=grid_spec, compiler_params=cparams,
    )(y2, ysc, s2.reshape(1, coutp), b2.reshape(1, coutp),
      ssc.reshape(1, coutp), bsc.reshape(1, coutp))


# ------------------------------- block forward --------------------------------
def basic_block_forward(x_nchw, params, in_planes, planes, stride):
    x = jnp.transpose(x_nchw, (0, 2, 3, 1)).astype(jnp.float32)    # NHWC
    coutp = _round_up(planes, LANE)
    has_projection = (stride != 1) or (in_planes != planes)

    # conv1 patches (bf16 im2col)
    p1, (n, ho, wo) = im2col(x, 3, stride, 1)
    m = n * ho * wo
    k1p = _round_up(p1.shape[1], LANE)
    k2p = _round_up(9 * planes, LANE)
    kscp = _round_up(in_planes, LANE) if has_projection else 0

    # Generation-aware tiling / VMEM budgeting (v7x: 64 MiB, v5e/v6e: 128 MiB).
    cap = _vmem_capacity_bytes()
    vmem_limit = min(cap // 2, 64 * 2**20)
    per_row = max(k1p * 2 + coutp * 4,
                  (k2p + kscp) * 2 + 2 * coutp * 4) + coutp * 4
    resident = 4 * (k1p + k2p + kscp) * coutp + (64 << 10)
    tile_m = _choose_tile_m(m, per_row, resident, int(vmem_limit * 0.7))
    m_pad = _round_up(m, tile_m)
    cparams = pltpu.CompilerParams(dimension_semantics=("parallel",),
                                   vmem_limit_bytes=int(vmem_limit))

    # ---- conv1 (3x3, stride) : tiled matmul + stats, then fused BN + ReLU ----
    p1b = _prep_patches(p1, m_pad, k1p)
    w1 = _prep_weight(params["conv1_w"], k1p, coutp)
    y1, st1 = matmul_stats(p1b, w1, tile_m=tile_m, cparams=cparams)
    sc1, sh1 = bn_affine(st1, m, _pad_vec(params["bn1_g"], coutp),
                         _pad_vec(params["bn1_b"], coutp))
    out1 = bn_relu(y1, sc1, sh1, tile_m=tile_m, cparams=cparams,
                   out_dtype=jnp.bfloat16)               # bf16 intermediate
    out1_nhwc = out1[:m, :planes].reshape(n, ho, wo, planes)

    # ---- conv2 (3x3, s=1) [+ fused 1x1 projection-shortcut matmul] ----
    p2, _ = im2col(out1_nhwc, 3, 1, 1)                   # stays bf16
    p2b = _prep_patches(p2, m_pad, k2p)
    w2 = _prep_weight(params["conv2_w"], k2p, coutp)

    if has_projection:
        psc, _ = im2col(x, 1, stride, 0)
        pscb = _prep_patches(psc, m_pad, kscp)
        wsc = _prep_weight(params["sc_w"], kscp, coutp)
        y2, ysc, st2, stsc = dual_matmul_stats(p2b, w2, pscb, wsc,
                                               tile_m=tile_m, cparams=cparams)
        scsc, shsc = bn_affine(stsc, m, _pad_vec(params["sc_g"], coutp),
                               _pad_vec(params["sc_b"], coutp))
    else:
        y2, st2 = matmul_stats(p2b, w2, tile_m=tile_m, cparams=cparams)
        ysc = jnp.zeros((m_pad, coutp), jnp.float32).at[:m, :in_planes].set(
            x.reshape(m, in_planes))
        scsc = jnp.ones((coutp,), jnp.float32)
        shsc = jnp.zeros((coutp,), jnp.float32)

    sc2, sh2 = bn_affine(st2, m, _pad_vec(params["bn2_g"], coutp),
                         _pad_vec(params["bn2_b"], coutp))
    out = bn_add_relu(y2, ysc, sc2, sh2, scsc, shsc,
                      tile_m=tile_m, cparams=cparams)
    out_nhwc = out[:m, :planes].reshape(n, ho, wo, planes)
    return jnp.transpose(out_nhwc, (0, 3, 1, 2))          # back to NCHW, f32


# ----------------------------- pure-JAX references -----------------------------
def _ref_conv(x, w, stride, pad, mixed):
    if mixed:   # mirror the kernel's bf16 MXU inputs (f32 accumulate)
        x = x.astype(jnp.bfloat16).astype(jnp.float32)
        w = w.astype(jnp.bfloat16).astype(jnp.float32)
    return jax.lax.conv_general_dilated(
        x, w, (stride, stride), [(pad, pad), (pad, pad)],
        dimension_numbers=("NCHW", "OIHW", "NCHW"))


def _ref_bn(x, g, b):
    mean = jnp.mean(x, axis=(0, 2, 3), keepdims=True)
    var = jnp.mean(jnp.square(x - mean), axis=(0, 2, 3), keepdims=True)
    return (x - mean) * jax.lax.rsqrt(var + EPS) * g[None, :, None, None] \
        + b[None, :, None, None]


def reference_forward(x, params, in_planes, planes, stride, mixed=False):
    out = jax.nn.relu(_ref_bn(_ref_conv(x, params["conv1_w"], stride, 1, mixed),
                              params["bn1_g"], params["bn1_b"]))
    out = _ref_bn(_ref_conv(out, params["conv2_w"], 1, 1, mixed),
                  params["bn2_g"], params["bn2_b"])
    if stride != 1 or in_planes != planes:
        sc = _ref_bn(_ref_conv(x, params["sc_w"], stride, 0, mixed),
                     params["sc_g"], params["sc_b"])
    else:
        sc = x
    return jax.nn.relu(out + sc)


# ------------------------------------ main -------------------------------------
if __name__ == "__main__":
    key = jax.random.PRNGKey(0)

    def make_params(k0, in_planes, planes):
        k = jax.random.split(k0, 8)
        return {
            "conv1_w": 0.1 * jax.random.normal(k[0], (planes, in_planes, 3, 3), jnp.float32),
            "conv2_w": 0.1 * jax.random.normal(k[1], (planes, planes, 3, 3), jnp.float32),
            "sc_w":    0.1 * jax.random.normal(k[2], (planes, in_planes, 1, 1), jnp.float32),
            "bn1_g": 1.0 + 0.1 * jax.random.normal(k[3], (planes,), jnp.float32),
            "bn1_b": 0.1 * jax.random.normal(k[4], (planes,), jnp.float32),
            "bn2_g": 1.0 + 0.1 * jax.random.normal(k[5], (planes,), jnp.float32),
            "bn2_b": 0.1 * jax.random.normal(k[6], (planes,), jnp.float32),
            "sc_g": jnp.ones((planes,), jnp.float32),
            "sc_b": jnp.zeros((planes,), jnp.float32),
        }

    # Case 1: projection shortcut (stride 2, channel change) -- matches prior run.
    N, IN_PLANES, PLANES, H, W, STRIDE = 2, 4, 8, 16, 16, 2
    kparam, kx = jax.random.split(key)
    params = make_params(kparam, IN_PLANES, PLANES)
    x = jax.random.normal(kx, (N, IN_PLANES, H, W), jnp.float32)

    out = jax.block_until_ready(
        basic_block_forward(x, params, IN_PLANES, PLANES, STRIDE))
    assert out.shape == (N, PLANES, H // STRIDE, W // STRIDE), out.shape

    ref_mp = reference_forward(x, params, IN_PLANES, PLANES, STRIDE, mixed=True)
    ref_f32 = reference_forward(x, params, IN_PLANES, PLANES, STRIDE, mixed=False)
    err_mp = float(jnp.max(jnp.abs(out - ref_mp)))
    err_f32 = float(jnp.max(jnp.abs(out - ref_f32)))
    # Tight check vs a reference with matching bf16-input precision policy;
    # loose check vs the pure-f32 PyTorch-semantics reference.
    assert jnp.allclose(out, ref_mp, rtol=5e-3, atol=5e-3), err_mp
    assert jnp.allclose(out, ref_f32, rtol=1e-1, atol=1e-1), err_f32

    # Case 2: identity shortcut (stride 1, same channels).
    N2, P2, H2, W2 = 2, 8, 8, 8
    kparam2, kx2 = jax.random.split(kx)
    params2 = make_params(kparam2, P2, P2)
    x2 = jax.random.normal(kx2, (N2, P2, H2, W2), jnp.float32)
    out2 = jax.block_until_ready(basic_block_forward(x2, params2, P2, P2, 1))
    assert out2.shape == (N2, P2, H2, W2), out2.shape
    ref2 = reference_forward(x2, params2, P2, P2, 1, mixed=True)
    err2 = float(jnp.max(jnp.abs(out2 - ref2)))
    assert jnp.allclose(out2, ref2, rtol=5e-3, atol=5e-3), err2

    print("KERNEL_OK")
</pallas_src>

<mosaic_0001>
module attributes {stable_mosaic.version = 11 : i64} {
  func.func @_matmul_stats_kernel(%arg0: i32, %arg1: memref<128x128xbf16, #tpu.memory_space<vmem>>, %arg2: memref<128x128xbf16, #tpu.memory_space<vmem>>, %arg3: memref<128x128xf32, #tpu.memory_space<vmem>>, %arg4: memref<1x8x128xf32, #tpu.memory_space<vmem>>) attributes {dimension_semantics = [#tpu.dimension_semantics<parallel>], iteration_bounds = array<i64: 1>, scalar_prefetch = 0 : i64, scratch_operands = 0 : i64, tpu.core_type = #tpu.core_type<tc>, window_params = [{transform_indices = @transform_0, window_bounds = array<i64: 128, 128>}, {pipeline_mode = #tpu.pipeline_mode<synchronous>, transform_indices = @transform_1, window_bounds = array<i64: 128, 128>}, {transform_indices = @transform_2, window_bounds = array<i64: 128, 128>}, {transform_indices = @transform_3, window_bounds = array<i64: 1, 8, 128>}]} {
    %c0 = arith.constant 0 : index
    %c0_0 = arith.constant 0 : index
    %0 = vector.load %arg1[%c0, %c0_0] : memref<128x128xbf16, #tpu.memory_space<vmem>>, vector<128x128xbf16>
    %c0_1 = arith.constant 0 : index
    %c0_2 = arith.constant 0 : index
    %1 = vector.load %arg2[%c0_1, %c0_2] : memref<128x128xbf16, #tpu.memory_space<vmem>>, vector<128x128xbf16>
    %cst = arith.constant dense<0.000000e+00> : vector<128x128xf32>
    %2 = tpu.matmul %0, %1, %cst {dimension_numbers = #tpu.dot_dimension_numbers<[1], [0], [0], [1], [0, 0, 1, 1], [], []>} : vector<128x128xbf16>, vector<128x128xbf16>, vector<128x128xf32> -> vector<128x128xf32>
    %c0_3 = arith.constant 0 : index
    %c0_4 = arith.constant 0 : index
    %3 = vector.load %arg3[%c0_3, %c0_4] : memref<128x128xf32, #tpu.memory_space<vmem>>, vector<128x128xf32>
    tpu.vector_store %arg3[%c0_3, %c0_4], %2 {strides = array<i32>} : memref<128x128xf32, #tpu.memory_space<vmem>>, vector<128x128xf32>,
    %cst_5 = arith.constant dense<0.000000e+00> : vector<128xf32>
    %4 = vector.multi_reduction <add>, %2, %cst_5 [0] : vector<128x128xf32> to vector<128xf32>
    %5 = vector.shape_cast %4 : vector<128xf32> to vector<1x128xf32>
    %6 = arith.mulf %2, %2 : vector<128x128xf32>
    %cst_6 = arith.constant dense<0.000000e+00> : vector<128xf32>
    %7 = vector.multi_reduction <add>, %6, %cst_6 [0] : vector<128x128xf32> to vector<128xf32>
    %8 = vector.shape_cast %7 : vector<128xf32> to vector<1x128xf32>
    %cst_7 = arith.constant 0.000000e+00 : f32
    %9 = vector.broadcast %cst_7 : f32 to vector<6x128xf32>
    %10 = tpu.concatenate %5, %8, %9 in 0 : vector<1x128xf32>, vector<1x128xf32>, vector<6x128xf32> -> vector<8x128xf32>
    %c0_8 = arith.constant 0 : index
    %c0_9 = arith.constant 0 : index
    %c0_10 = arith.constant 0 : index
    %11 = vector.load %arg4[%c0_8, %c0_9, %c0_10] : memref<1x8x128xf32, #tpu.memory_space<vmem>>, vector<1x8x128xf32>
    %12 = vector.shape_cast %11 : vector<1x8x128xf32> to vector<8x128xf32>
    %13 = vector.shape_cast %10 : vector<8x128xf32> to vector<1x8x128xf32>
    tpu.vector_store %arg4[%c0_8, %c0_9, %c0_10], %13 {strides = array<i32>} : memref<1x8x128xf32, #tpu.memory_space<vmem>>, vector<1x8x128xf32>,
    return
  }
  func.func @transform_0(%arg0: i32) -> (i32, i32) {
    %c0_i32 = arith.constant 0 : i32
    %c0_i32_0 = arith.constant 0 : i32
    return %arg0, %c0_i32 : i32, i32
  }
  func.func @transform_1(%arg0: i32) -> (i32, i32) {
    %c0_i32 = arith.constant 0 : i32
    %c0_i32_0 = arith.constant 0 : i32
    %c0_i32_1 = arith.constant 0 : i32
    return %c0_i32, %c0_i32_0 : i32, i32
  }
  func.func @transform_2(%arg0: i32) -> (i32, i32) {
    %c0_i32 = arith.constant 0 : i32
    %c0_i32_0 = arith.constant 0 : i32
    return %arg0, %c0_i32 : i32, i32
  }
  func.func @transform_3(%arg0: i32) -> (i32, i32, i32) {
    %c0_i32 = arith.constant 0 : i32
    %c0_i32_0 = arith.constant 0 : i32
    %c0_i32_1 = arith.constant 0 : i32
    return %arg0, %c0_i32, %c0_i32_0 : i32, i32, i32
  }
}

</mosaic_0001>

<bundles_post_ra>
// kernel: tpu_custom_call.1
= control target key start
LH: loop header
LB: loop body
LE: loop exit
PB: predicated region body
PF: predicated region fallthrough
CT: control target
= control target key end

     0   :  { %9 = vsyncpa [#allocation3], 0  ;;  %s607_s0 = inlined_call_operand.hbm [shape: bf16[128,128], index: 0, kind: input, shape index: {}]   ;;  %s608_s1 = inlined_call_operand.hbm [shape: bf16[128,128], index: 1, kind: input, shape index: {}]   ;;  %s609_s2 = inlined_call_operand.hbm [shape: f32[128,128], index: 2, kind: output, shape index: {0}]   ;;  %s610_s3 = inlined_call_operand.hbm [shape: f32[1,8,128], index: 3, kind: output, shape index: {1}]  }
   0x1   :  { %10 = vsyncpa [#allocation6], 0 }
   0x2   :  { %11 = vsyncpa [#allocation4], 0 }
   0x3   :  { %12 = vsyncpa [#allocation9], 0  ;;  %s17_s14 = sshll.u32 %s607_s0, 4  ;;  %s555_s15 = smov [#allocation2]   ;;  %s18_s14 = int_to_ptr.hbm [resolvable:$true] %s17_s14 }
   0x4   :  { %s19_s16 = sshll.u32 %s555_s15, 4  ;;  %s30_s19 = sshll.u32 %s608_s1, 4  ;;  %s20_s16 = int_to_ptr.vmem [resolvable:$true] %s19_s16  ;;  %s31_s19 = int_to_ptr.hbm [resolvable:$true] %s30_s19 }
   0x5   :  { %s556_s20 = smov 64   ;;  %s557_s21 = smov 4  }
   0x6   :  { %25 = dma.hbm_to_vmem [thread:$0]  %s18_s14, 1024, %s20_s16, [#allocation3], %s556_s20, %s556_s20, %s557_s21  }
   0x7   :  { %s558_s22 = smov [#allocation5]  }
   0x8   :  { %s32_s23 = sshll.u32 %s558_s22, 4  ;;  %s33_s23 = int_to_ptr.vmem [resolvable:$true] %s32_s23 }
   0x9   :  { %38 = dma.hbm_to_vmem [thread:$0]  %s31_s19, 1024, %s33_s23, [#allocation6], %s556_s20, %s556_s20, %s557_s21  }
   0xa   :  { %547 = dma.done.wait [#allocation3], 1024  }
   0xb   :  { %548 = vsyncadd [#allocation3], 4294966272 }
   0xc   :  { %549 = dma.done.wait [#allocation6], 1024  }
   0xd   :  { %550 = vsyncadd [#allocation6], 4294966272  ;;  %v418_v0 = vld [vmem:[#allocation5 + $0x38] sm:$0xff]  ;;  %v417_v1 = vld [vmem:[#allocation5 + $0x30] sm:$0xff]  ;;  %s559_s0 = smov [#allocation7]   ;;  %s309_s26 = sshll.u32 %s609_s2, 4  ;;  %s310_s26 = int_to_ptr.hbm [resolvable:$true] %s309_s26 }
   0xe   :  { %175 = vmatpush.bf16.msra.mxu0 %v418_v0  ;;  %419 = vmatpush.bf16.msra.mxu1 %v418_v0  ;;  %v416_v2 = vld [vmem:[#allocation5 + $0x28] sm:$0xff]  ;;  %v415_v3 = vld [vmem:[#allocation5 + $0x20] sm:$0xff]  ;;  %v414_v4 = vld [vmem:[#allocation5 + $0x18] sm:$0xff]  ;;  %s307_s1 = sshll.u32 %s559_s0, 4  ;;  %s560_s27 = smov 128   ;;  %vm298_vm0 = vcmask 1040384   ;;  %s308_s1 = int_to_ptr.vmem [resolvable:$true] %s307_s1 }
   0xf   :  { %420 = vmatpush.bf16.msra.mxu2 %v418_v0  ;;  %421 = vmatpush.bf16.msra.mxu3 %v418_v0  ;;  %v413_v5 = vld [vmem:[#allocation5 + $0x10] sm:$0xff]  ;;  %v412_v6 = vld [vmem:[#allocation5 + $0x8] sm:$0xff]  ;;  %v411_v7 = vld [vmem:[#allocation5] sm:$0xff]  ;;  %s561_s28 = smov 8   ;;  %s562_s2 = smov [#allocation8]   ;;  %vm300_vm1 = vcmask 1041408  }
  0x10   :  { %v403_v8 = vld [vmem:[#allocation2] sm:$0xff]  ;;  %v405_v9 = vld [vmem:[#allocation2 + $0x10] sm:$0xff]  ;;  %v404_v12 = vld [vmem:[#allocation2 + $0x8] sm:$0xff]  ;;  %s321_s29 = sshll.u32 %s562_s2, 4  ;;  %s323_s5 = sshll.u32 %s610_s3, 4  ;;  %s322_s29 = int_to_ptr.vmem [resolvable:$true] %s321_s29  ;;  %s324_s5 = int_to_ptr.hbm [resolvable:$true] %s323_s5 }
  0x11   :  { %v407_v10 = vld [vmem:[#allocation2 + $0x20] sm:$0xff]  ;;  %v409_v11 = vld [vmem:[#allocation2 + $0x30] sm:$0xff]  ;;  %v406_v13 = vld [vmem:[#allocation2 + $0x18] sm:$0xff] }
  0x12   :  { %176 = vmatpush.bf16.msra.mxu0 %v417_v1  ;;  %422 = vmatpush.bf16.msra.mxu1 %v417_v1  ;;  %v408_v14 = vld [vmem:[#allocation2 + $0x28] sm:$0xff]  ;;  %v410_v15 = vld [vmem:[#allocation2 + $0x38] sm:$0xff] }
  0x13   :  { %423 = vmatpush.bf16.msra.mxu2 %v417_v1  ;;  %424 = vmatpush.bf16.msra.mxu3 %v417_v1 }
  0x16   :  { %177 = vmatpush.bf16.msra.mxu0 %v416_v2  ;;  %425 = vmatpush.bf16.msra.mxu1 %v416_v2 }
  0x17   :  { %426 = vmatpush.bf16.msra.mxu2 %v416_v2  ;;  %427 = vmatpush.bf16.msra.mxu3 %v416_v2 }
  0x1a   :  { %178 = vmatpush.bf16.msra.mxu0 %v415_v3  ;;  %428 = vmatpush.bf16.msra.mxu1 %v415_v3 }
  0x1b   :  { %429 = vmatpush.bf16.msra.mxu2 %v415_v3  ;;  %430 = vmatpush.bf16.msra.mxu3 %v415_v3 }
  0x1e   :  { %179 = vmatpush.bf16.msra.mxu0 %v414_v4  ;;  %431 = vmatpush.bf16.msra.mxu1 %v414_v4 }
  0x1f   :  { %432 = vmatpush.bf16.msra.mxu2 %v414_v4  ;;  %433 = vmatpush.bf16.msra.mxu3 %v414_v4 }
  0x22   :  { %180 = vmatpush.bf16.msra.mxu0 %v413_v5  ;;  %434 = vmatpush.bf16.msra.mxu1 %v413_v5 }
  0x23   :  { %435 = vmatpush.bf16.msra.mxu2 %v413_v5  ;;  %436 = vmatpush.bf16.msra.mxu3 %v413_v5 }
  0x26   :  { %181 = vmatpush.bf16.msra.mxu0 %v412_v6  ;;  %437 = vmatpush.bf16.msra.mxu1 %v412_v6 }
  0x27   :  { %438 = vmatpush.bf16.msra.mxu2 %v412_v6  ;;  %439 = vmatpush.bf16.msra.mxu3 %v412_v6 }
  0x2a   :  { %182 = vmatpush.bf16.msra.mxu0 %v411_v7  ;;  %440 = vmatpush.bf16.msra.mxu1 %v411_v7 }
  0x2b   :  { %441 = vmatpush.bf16.msra.mxu2 %v411_v7  ;;  %442 = vmatpush.bf16.msra.mxu3 %v411_v7 }
  0x2d   :  { %183 = vmatmul.bf16.vlgmr.msra.gmra.mxu0 %v403_v8  ;;  %193 = vmatmul.bf16.vlgmr.msra.gmra.mxu1 %v405_v9 }
  0x2e   :  { %203 = vmatmul.bf16.vlgmr.msra.gmra.mxu2 %v407_v10  ;;  %213 = vmatmul.bf16.vlgmr.msra.gmra.mxu3 %v409_v11 }
  0x3d   :  { %188 = vmatmul.bf16.gmra.mxu0 %v404_v12  ;;  %198 = vmatmul.bf16.gmra.mxu1 %v406_v13 }
  0x3e   :  { %208 = vmatmul.bf16.gmra.mxu2 %v408_v14  ;;  %218 = vmatmul.bf16.gmra.mxu3 %v410_v15 }
  0xaa   :  { %v184_v16 = vpop.f32.mrf.mxu0  ;;  %v194_v17 = vpop.f32.mrf.mxu1 }
  0xab   :  { %224 = vst [vmem:[#allocation7] sm:$0xff] %v184_v16  ;;  %v261_v27 = vmul.f32 %v184_v16, %v184_v16  ;;  %v265_v39 = vmul.f32 %v194_v17, %v194_v17 }
  0xac   :  { %228 = vst [vmem:[#allocation7 + $0x20] sm:$0xff] %v194_v17 }
  0xb1   :  { %v204_v18 = vpop.f32.mrf.mxu2  ;;  %v589_v19 = vpop.f32.mrf.mxu3 }
  0xb2   :  { %v186_v20 = vpop.f32.mrf.mxu0  ;;  %v196_v21 = vpop.f32.mrf.mxu1  ;;  %232 = vst [vmem:[#allocation7 + $0x40] sm:$0xff] %v204_v18  ;;  %v269_v53 = vmul.f32 %v204_v18, %v204_v18  ;;  %v273_v1 = vmul.f32 %v589_v19, %v589_v19 }
  0xb3   :  { %225 = vst [vmem:[#allocation7 + $0x8] sm:$0xff] %v186_v20  ;;  %v262_v26 = vmul.f32 %v186_v20, %v186_v20  ;;  %v240_v28 = vadd.f32 %v186_v20, %v184_v16  ;;  %v266_v42 = vmul.f32 %v196_v21, %v196_v21 }
  0xb4   :  { %229 = vst [vmem:[#allocation7 + $0x28] sm:$0xff] %v196_v21 }
  0xb5   :  { %236 = vst [vmem:[#allocation7 + $0x60] sm:$0xff] %v589_v19  ;;  %v277_v30 = vadd.f32 %v262_v26, %v261_v27 }
  0xb9   :  { %v206_v22 = vpop.f32.mrf.mxu2  ;;  %v592_v23 = vpop.f32.mrf.mxu3 }
  0xba   :  { %v189_v24 = vpop.f32.mrf.mxu0  ;;  %v199_v25 = vpop.f32.mrf.mxu1  ;;  %233 = vst [vmem:[#allocation7 + $0x48] sm:$0xff] %v206_v22  ;;  %v270_v56 = vmul.f32 %v206_v22, %v206_v22  ;;  %v274_v4 = vmul.f32 %v592_v23, %v592_v23 }
  0xbb   :  { %226 = vst [vmem:[#allocation7 + $0x10] sm:$0xff] %v189_v24  ;;  %v263_v29 = vmul.f32 %v189_v24, %v189_v24  ;;  %v241_v31 = vadd.f32 %v240_v28, %v189_v24  ;;  %v267_v45 = vmul.f32 %v199_v25, %v199_v25 }
  0xbc   :  { %230 = vst [vmem:[#allocation7 + $0x30] sm:$0xff] %v199_v25 }
  0xbd   :  { %237 = vst [vmem:[#allocation7 + $0x68] sm:$0xff] %v592_v23  ;;  %v278_v36 = vadd.f32 %v277_v30, %v263_v29 }
  0xc1   :  { %v209_v32 = vpop.f32.mrf.mxu2  ;;  %v219_v33 = vpop.f32.mrf.mxu3 }
  0xc2   :  { %v191_v34 = vpop.f32.mrf.mxu0  ;;  %v201_v35 = vpop.f32.mrf.mxu1  ;;  %234 = vst [vmem:[#allocation7 + $0x50] sm:$0xff] %v209_v32  ;;  %v271_v60 = vmul.f32 %v209_v32, %v209_v32  ;;  %v275_v8 = vmul.f32 %v219_v33, %v219_v33 }
  0xc3   :  { %227 = vst [vmem:[#allocation7 + $0x18] sm:$0xff] %v191_v34  ;;  %v242_v37 = vadd.f32 %v241_v31, %v191_v34  ;;  %v264_v38 = vmul.f32 %v191_v34, %v191_v34  ;;  %v268_v51 = vmul.f32 %v201_v35, %v201_v35 }
  0xc4   :  { %231 = vst [vmem:[#allocation7 + $0x38] sm:$0xff] %v201_v35 }
  0xc5   :  { %v243_v40 = vadd.f32 %v242_v37, %v194_v17  ;;  %v279_v41 = vadd.f32 %v278_v36, %v264_v38  ;;  %238 = vst [vmem:[#allocation7 + $0x70] sm:$0xff] %v219_v33 }
  0xc7   :  { %v280_v43 = vadd.f32 %v279_v41, %v265_v39  ;;  %v244_v44 = vadd.f32 %v243_v40, %v196_v21 }
  0xc9   :  { %v245_v46 = vadd.f32 %v244_v44, %v199_v25  ;;  %v281_v47 = vadd.f32 %v280_v43, %v266_v42  ;;  %v211_v48 = vpop.f32.mrf.mxu2  ;;  %v221_v49 = vpop.f32.mrf.mxu3 }
  0xca   :  { %235 = vst [vmem:[#allocation7 + $0x58] sm:$0xff] %v211_v48  ;;  %v272_v0 = vmul.f32 %v211_v48, %v211_v48  ;;  %v276_v12 = vmul.f32 %v221_v49, %v221_v49 }
  0xcb   :  { %v246_v50 = vadd.f32 %v245_v46, %v201_v35  ;;  %v282_v52 = vadd.f32 %v281_v47, %v267_v45  ;;  %239 = vst [vmem:[#allocation7 + $0x78] sm:$0xff] %v221_v49 }
  0xcc   :  { %315 = dma.vmem_to_hbm [thread:$0]  %s308_s1, 2048, %s310_s26, [#allocation4], %s560_s27, %s560_s27, %s561_s28  }
  0xcd   :  { %v247_v54 = vadd.f32 %v246_v50, %v204_v18  ;;  %v283_v55 = vadd.f32 %v282_v52, %v268_v51 }
  0xcf   :  { %v284_v57 = vadd.f32 %v283_v55, %v269_v53  ;;  %v248_v58 = vadd.f32 %v247_v54, %v206_v22 }
  0xd1   :  { %v249_v59 = vadd.f32 %v248_v58, %v209_v32  ;;  %v285_v61 = vadd.f32 %v284_v57, %v270_v56 }
  0xd3   :  { %v286_v62 = vadd.f32 %v285_v61, %v271_v60  ;;  %v250_v63 = vadd.f32 %v249_v59, %v211_v48 }
  0xd5   :  { %v251_v2 = vadd.f32 %v250_v63, %v589_v19  ;;  %v287_v3 = vadd.f32 %v286_v62, %v272_v0 }
  0xd7   :  { %v288_v5 = vadd.f32 %v287_v3, %v273_v1  ;;  %v252_v6 = vadd.f32 %v251_v2, %v592_v23 }
  0xd9   :  { %v253_v7 = vadd.f32 %v252_v6, %v219_v33  ;;  %v289_v9 = vadd.f32 %v288_v5, %v274_v4 }
  0xdb   :  { %v290_v10 = vadd.f32 %v289_v9, %v275_v8  ;;  %v254_v11 = vadd.f32 %v253_v7, %v221_v49 }
  0xdd   :  { %v255_v13 = vrot.slane %v254_v11, 4  ;;  %v291_v14 = vadd.f32 %v290_v10, %v276_v12 }
  0xdf   :  { %v256_v15 = vadd.f32 %v255_v13, %v254_v11  ;;  %v292_v16 = vrot.slane %v291_v14, 4 }
  0xe1   :  { %v257_v17 = vrot.slane %v256_v15, 2  ;;  %v293_v18 = vadd.f32 %v292_v16, %v291_v14 }
  0xe3   :  { %v258_v19 = vadd.f32 %v257_v17, %v256_v15  ;;  %v294_v20 = vrot.slane %v293_v18, 2 }
  0xe5   :  { %v259_v21 = vrot.slane %v258_v19, 1  ;;  %v295_v22 = vadd.f32 %v294_v20, %v293_v18 }
  0xe7   :  { %v296_v24 = vrot.slane %v295_v22, 1  ;;  %v260_v23 = vadd.f32 %v259_v21, %v258_v19 }
  0xe9   :  { %v297_v25 = vadd.f32 %v296_v24, %v295_v22 }
  0xeb   :  { %v299_v26 = vsel %vm298_vm0, %v260_v23, %v297_v25 }
  0xec   :  { %v301_v27 = vsel %vm300_vm1, %v299_v26, 0.0 }
  0xed   :  { %302 = vst [vmem:[#allocation8] sm:$0xff] %v301_v27 }
  0xee   :  { %326 = dma.vmem_to_hbm [thread:$0]  %s322_s29, 128, %s324_s5, [#allocation9]  }
  0xef   :  { %551 = dma.done.wait [#allocation4], 2048  }
  0xf0   :  { %552 = vsyncadd [#allocation4], 4294965248 }
  0xf1   :  { %553 = dma.done.wait [#allocation9], 128  }
  0xf2   :  { %554 = vsyncadd [#allocation9], 4294967168 }
  0xf3   :  { %335 = vsyncpa [#allocation3], 1 }
  0xf4   :  { %336 = vsyncpa [#allocation6], 1 }
  0xf5   :  { %337 = vsyncpa [#allocation4], 1 }
  0xf6   :  { %338 = vsyncpa [#allocation9], 1 }

</bundles_post_ra>
